<compile_context>
chip_gen: v5e
topology: v5e:2x2
jax: 0.10.0
libtpu: 0.0.40
codegen_flags: <defaults>
</compile_context>

<pallas_src>
import functools

import jax
import jax.numpy as jnp
from jax.experimental import pallas as pl
from jax.experimental.pallas import tpu as pltpu


# ----------------------------------------------------------------------------
# Pallas kernel: streaming AmdimNCELoss forward
# ----------------------------------------------------------------------------
def _amdim_nce_kernel(src_ref, trg_ref, mask_ref, loss_ref, reg_ref,
                      m_sc, l_sc, pos_sc, reg_sc, *, tclip, nfv):
    """Grid: (b_target, n_hw_tiles).

    Per step:
      src_ref : (b, c)      anchor representations (VMEM resident)
      trg_ref : (c, thw)    spatial tile of target batch element j
      mask_ref: (b, b)      mask_mat (VMEM resident)
    Scratch (persists across the grid):
      m_sc  (b, 1)          running max of negative scores
      l_sc  (b, 1)          running sum-exp of negatives (relative to m_sc)
      pos_sc(nt, b, thw)    positive scores, laid out per spatial tile
      reg_sc(1, 1)          running sum of (raw / tclip)^2
    """
    j = pl.program_id(0)
    t = pl.program_id(1)
    nj = pl.num_programs(0)
    nt = pl.num_programs(1)

    @pl.when(jnp.logical_and(j == 0, t == 0))
    def _init():
        m_sc[...] = jnp.full_like(m_sc, -jnp.inf)
        l_sc[...] = jnp.zeros_like(l_sc)
        pos_sc[...] = jnp.zeros_like(pos_sc)
        reg_sc[...] = jnp.zeros_like(reg_sc)

    src = src_ref[...]                                    # (b, c), native dtype
    trg = trg_ref[...]                                    # (c, thw), native dtype
    b, c = src.shape

    # u = raw_scores / (sqrt(c) * tclip): both scales folded into one multiply.
    scale = 1.0 / (float(c) ** 0.5 * tclip)
    u = jnp.dot(src, trg, preferred_element_type=jnp.float32) * scale  # (b, thw)

    # lgt_reg partial sum: raw^2 = (tclip * u)^2 ; constant applied at finalize.
    reg_sc[...] += jnp.sum(u * u, keepdims=True)

    clipped = tclip * jnp.tanh(u)                         # tanh_clip(raw_scores)

    # mask column j of mask_mat (general mask path): mask_col[r] = mask_mat[r, j]
    mask = mask_ref[...].astype(jnp.float32)
    col_sel = (jax.lax.broadcasted_iota(jnp.int32, mask.shape, 1) == j)
    mask_col = jnp.sum(mask * col_sel.astype(jnp.float32), axis=1, keepdims=True)

    # positive scores for this (j, spatial tile); accumulated over j.
    pos_sc[t] = pos_sc[t] + mask_col * clipped

    # negative scores (positives clamped to -tclip, exactly as the reference),
    # streamed through an online log-sum-exp.
    neg_scores = (1.0 - mask_col) * clipped - tclip * mask_col      # (b, thw)
    tile_max = jnp.max(neg_scores, axis=1, keepdims=True)           # (b, 1)
    m_prev = m_sc[...]
    m_new = jnp.maximum(m_prev, tile_max)
    alpha = jnp.exp(m_prev - m_new)
    l_sc[...] = l_sc[...] * alpha + jnp.sum(
        (1.0 - mask_col) * jnp.exp(neg_scores - m_new), axis=1, keepdims=True)
    m_sc[...] = m_new

    @pl.when(jnp.logical_and(j == nj - 1, t == nt - 1))
    def _finalize():
        m = m_sc[...]                                     # (b, 1)
        l = l_sc[...]                                     # (b, 1)
        pos_shift = pos_sc[...] - m                       # (nt, b, thw)
        all_lse = jnp.log(jnp.exp(pos_shift) + l)
        per = pos_shift - all_lse                         # (nt, b, thw)
        tmp = jnp.sum(per, axis=0)                        # (b, thw)
        loss_ref[...] = -jnp.sum(tmp, keepdims=True) * (1.0 / (b * nfv))
        reg_ref[...] = reg_sc[...] * (0.05 * tclip * tclip / (b * b * nfv))


def _pick_hw_tile(hw, target=1024):
    """Largest multiple-of-128 divisor of hw that is <= target, else full hw."""
    best = None
    cand = 128
    while cand <= min(hw, target):
        if hw % cand == 0:
            best = cand
        cand += 128
    return best if best is not None else hw


@functools.partial(jax.jit, static_argnames=("tclip",))
def amdim_nce_loss(r_src, trg_maps, mask_mat, *, tclip):
    """AmdimNCELoss forward.

    r_src:    (b, c)      anchor representations.
    trg_maps: (b, c, hw)  positive feature map, spatially flattened.  This is
                          the same data as the reference's r_trg =
                          m2.permute(1,0,2,3).reshape(c, -1) but consumed
                          without the HBM transpose.
    mask_mat: (b, b)
    Returns (nce_loss, lgt_reg) f32 scalars.
    """
    b, c = r_src.shape
    bt, ct, hw = trg_maps.shape
    assert bt == b and ct == c, "anchor / positive shapes disagree"
    tclip = float(tclip)

    thw = _pick_hw_tile(hw)
    nt = hw // thw
    assert nt * thw == hw

    kernel = functools.partial(_amdim_nce_kernel, tclip=tclip, nfv=hw)

    loss, reg = pl.pallas_call(
        kernel,
        out_shape=(jax.ShapeDtypeStruct((1, 1), jnp.float32),
                   jax.ShapeDtypeStruct((1, 1), jnp.float32)),
        grid_spec=pltpu.PrefetchScalarGridSpec(
            num_scalar_prefetch=0,
            grid=(b, nt),
            in_specs=[
                pl.BlockSpec((b, c), lambda j, t: (0, 0)),             # resident
                pl.BlockSpec((None, c, thw), lambda j, t: (j, 0, t)),  # streamed
                pl.BlockSpec((b, b), lambda j, t: (0, 0)),             # resident
            ],
            out_specs=(
                pl.BlockSpec((1, 1), lambda j, t: (0, 0)),
                pl.BlockSpec((1, 1), lambda j, t: (0, 0)),
            ),
            scratch_shapes=[
                pltpu.VMEM((b, 1), jnp.float32),        # running max
                pltpu.VMEM((b, 1), jnp.float32),        # running sum-exp
                pltpu.VMEM((nt, b, thw), jnp.float32),  # positive scores
                pltpu.VMEM((1, 1), jnp.float32),        # lgt_reg partial sum
            ],
        ),
        compiler_params=pltpu.CompilerParams(
            dimension_semantics=("arbitrary", "arbitrary"),
            vmem_limit_bytes=48 * 1024 * 1024,
        ),
    )(r_src, trg_maps, mask_mat.astype(jnp.float32))
    return loss[0, 0], reg[0, 0]


# ----------------------------------------------------------------------------
# Glue: FeatureMapContrastiveTask forward (no learnable parameters)
# ----------------------------------------------------------------------------
class FeatureMapContrastiveTask:
    def __init__(self, comparisons: str = "00, 11", tclip: float = 10.0,
                 bidirectional: bool = True):
        self.tclip = float(tclip)
        self.bidirectional = bidirectional
        self.map_indexes = self.parse_map_indexes(comparisons)
        self.comparisons = comparisons

    @staticmethod
    def parse_map_indexes(comparisons):
        out = []
        for tup in [x.strip() for x in comparisons.split(",")]:
            a, b = tup
            out.append((-1 if a == "r" else int(a), -1 if b == "r" else int(b)))
        return out

    def _sample_src_ftr(self, m, key):
        # Randomly select one spatial location per batch element (the PyTorch
        # code does this via randomly-indexed boolean masks + masked_select).
        b, c, h, w = m.shape
        idx = jax.random.randint(key, (b,), 0, h * w)
        m_flat = m.reshape(b, c, h * w)
        return jnp.take_along_axis(m_flat, idx[:, None, None], axis=2)[..., 0]  # (b, c)

    def _compare_maps(self, m1, m2, key):
        b, c, h, w = m1.shape
        src = self._sample_src_ftr(m1, key)       # (b, c)
        tgt = m2.reshape(b, c, h * w)             # free reshape; no HBM transpose
        mask = jnp.eye(b, dtype=jnp.float32)
        return amdim_nce_loss(src, tgt, mask, tclip=self.tclip)

    def __call__(self, anchor_maps, positive_maps, key):
        assert len(anchor_maps) == len(self.map_indexes)
        regularizer = jnp.float32(0.0)
        losses = []
        # TODO(synk): the up-to-4 NCE invocations (comparisons x bidirectional)
        # could be batched into a single pallas_call with a leading 'parallel'
        # grid axis (fills MXU rows at small b; uses both TensorCores on v7x);
        # kept as separate calls here to avoid extra HBM copies when stacking.
        for ai, pi in self.map_indexes:
            # TODO(synk): 'r' comparisons use host-side np.random.randint in
            # PyTorch; resolved deterministically to index 0 here.
            ai = 0 if ai == -1 else ai
            pi = 0 if pi == -1 else pi
            key, k1 = jax.random.split(key)
            loss1, reg1 = self._compare_maps(anchor_maps[ai], positive_maps[pi], k1)
            map_loss, map_reg = loss1, reg1
            if self.bidirectional:
                key, k2 = jax.random.split(key)
                loss2, reg2 = self._compare_maps(positive_maps[ai], anchor_maps[pi], k2)
                map_loss = 0.5 * (loss1 + loss2)
                map_reg = 0.5 * (reg1 + reg2)
            regularizer = regularizer + map_reg
            losses.append(map_loss)
        return jnp.stack(losses), regularizer


# ----------------------------------------------------------------------------
# Pure-JAX reference of AmdimNCELoss for a correctness check
# ----------------------------------------------------------------------------
def _nce_ref(r_src, trg_maps, mask_mat, tclip):
    b, c = r_src.shape
    hw = trg_maps.shape[2]
    r_trg = jnp.transpose(trg_maps, (1, 0, 2)).reshape(c, b * hw)
    nfv = hw
    mask_pos = jnp.broadcast_to(mask_mat[:, :, None], (b, b, nfv)).astype(jnp.float32)
    mask_neg = 1.0 - mask_pos
    raw = (r_src.astype(jnp.float32) @ r_trg.astype(jnp.float32)).reshape(b, b, nfv)
    raw = raw / c ** 0.5
    lgt_reg = 0.05 * jnp.mean(raw ** 2)
    raw = tclip * jnp.tanh(raw / tclip)
    pos_scores = jnp.sum(mask_pos * raw, axis=1)
    neg_scores = (mask_neg * raw - tclip * mask_pos).reshape(b, -1)
    mask_neg_f = mask_neg.reshape(b, -1)
    neg_maxes = jnp.max(neg_scores, axis=1, keepdims=True)
    neg_sumexp = jnp.sum(mask_neg_f * jnp.exp(neg_scores - neg_maxes), axis=1, keepdims=True)
    all_lse = jnp.log(jnp.exp(pos_scores - neg_maxes) + neg_sumexp)
    nce = -jnp.mean((pos_scores - neg_maxes) - all_lse)
    return nce, lgt_reg


if __name__ == "__main__":
    key = jax.random.PRNGKey(0)
    k1, k2, k3, k4, ksample, kcheck = jax.random.split(key, 6)

    B, C = 2, 32
    anc0 = jax.random.normal(k1, (B, C, 8, 8), jnp.float32)
    anc1 = jax.random.normal(k2, (B, C, 4, 4), jnp.float32)
    pos0 = jax.random.normal(k3, (B, C, 8, 8), jnp.float32)
    pos1 = jax.random.normal(k4, (B, C, 4, 4), jnp.float32)

    task = FeatureMapContrastiveTask("00, 11", tclip=10.0, bidirectional=True)
    losses, regularizer = task((anc0, anc1), (pos0, pos1), key=ksample)
    jax.block_until_ready((losses, regularizer))

    # sanity check the streaming Pallas NCE kernel against the pure-JAX reference
    src = jax.random.normal(kcheck, (B, C), jnp.float32)
    tgt = pos0.reshape(B, C, 8 * 8)
    mask = jnp.eye(B, dtype=jnp.float32)
    l_k, r_k = amdim_nce_loss(src, tgt, mask, tclip=10.0)
    l_r, r_r = _nce_ref(src, tgt, mask, 10.0)
    assert jnp.allclose(l_k, l_r, atol=2e-2, rtol=2e-2), (l_k, l_r)
    assert jnp.allclose(r_k, r_r, atol=2e-2, rtol=2e-2), (r_k, r_r)

    # bf16 path: operands go to the MXU in bf16 (no wrapper upcast)
    l_b, r_b = amdim_nce_loss(src.astype(jnp.bfloat16), tgt.astype(jnp.bfloat16),
                              mask, tclip=10.0)
    jax.block_until_ready((l_b, r_b))
    assert bool(jnp.isfinite(l_b)) and bool(jnp.isfinite(r_b))

    print("KERNEL_OK")
</pallas_src>

<mosaic_0001>
module attributes {stable_mosaic.version = 11 : i64} {
  func.func @_amdim_nce_kernel(%arg0: i32, %arg1: i32, %arg2: memref<2x32xf32, #tpu.memory_space<vmem>>, %arg3: memref<1x32x64xf32, #tpu.memory_space<vmem>>, %arg4: memref<2x2xf32, #tpu.memory_space<vmem>>, %arg5: memref<1x1xf32, #tpu.memory_space<vmem>>, %arg6: memref<1x1xf32, #tpu.memory_space<vmem>>, %arg7: memref<2x1xf32, #tpu.memory_space<vmem>>, %arg8: memref<2x1xf32, #tpu.memory_space<vmem>>, %arg9: memref<1x2x64xf32, #tpu.memory_space<vmem>>, %arg10: memref<1x1xf32, #tpu.memory_space<vmem>>) attributes {dimension_semantics = [#tpu.dimension_semantics<arbitrary>, #tpu.dimension_semantics<arbitrary>], iteration_bounds = array<i64: 2, 1>, scalar_prefetch = 0 : i64, scratch_operands = 4 : i64, tpu.core_type = #tpu.core_type<tc>, window_params = [{pipeline_mode = #tpu.pipeline_mode<synchronous>, transform_indices = @transform_0, window_bounds = array<i64: 2, 32>}, {transform_indices = @transform_1, window_bounds = array<i64: 1, 32, 64>}, {pipeline_mode = #tpu.pipeline_mode<synchronous>, transform_indices = @transform_2, window_bounds = array<i64: 2, 2>}, {pipeline_mode = #tpu.pipeline_mode<synchronous>, transform_indices = @transform_3, window_bounds = array<i64: 1, 1>}, {pipeline_mode = #tpu.pipeline_mode<synchronous>, transform_indices = @transform_4, window_bounds = array<i64: 1, 1>}]} {
    %c0_i32 = arith.constant 0 : i32
    %0 = arith.cmpi eq, %arg0, %c0_i32 : i32
    %c0_i32_0 = arith.constant 0 : i32
    %1 = arith.cmpi eq, %arg1, %c0_i32_0 : i32
    %2 = arith.andi %0, %1 : i1
    %3 = arith.extui %2 : i1 to i32
    %c0_i32_1 = arith.constant 0 : i32
    %4 = arith.cmpi ne, %3, %c0_i32_1 : i32
    scf.if %4 {
      %cst_35 = arith.constant 0xFF800000 : f32
      %75 = vector.broadcast %cst_35 : f32 to vector<2x1xf32>
      %c0_36 = arith.constant 0 : index
      %c0_37 = arith.constant 0 : index
      %76 = vector.load %arg7[%c0_36, %c0_37] : memref<2x1xf32, #tpu.memory_space<vmem>>, vector<2x1xf32>
      tpu.vector_store %arg7[%c0_36, %c0_37], %75 {strides = array<i32>} : memref<2x1xf32, #tpu.memory_space<vmem>>, vector<2x1xf32>,
      %cst_38 = arith.constant 0.000000e+00 : f32
      %77 = vector.broadcast %cst_38 : f32 to vector<2x1xf32>
      %c0_39 = arith.constant 0 : index
      %c0_40 = arith.constant 0 : index
      %78 = vector.load %arg8[%c0_39, %c0_40] : memref<2x1xf32, #tpu.memory_space<vmem>>, vector<2x1xf32>
      tpu.vector_store %arg8[%c0_39, %c0_40], %77 {strides = array<i32>} : memref<2x1xf32, #tpu.memory_space<vmem>>, vector<2x1xf32>,
      %cst_41 = arith.constant 0.000000e+00 : f32
      %79 = vector.broadcast %cst_41 : f32 to vector<1x2x64xf32>
      %c0_42 = arith.constant 0 : index
      %c0_43 = arith.constant 0 : index
      %c0_44 = arith.constant 0 : index
      %80 = vector.load %arg9[%c0_42, %c0_43, %c0_44] : memref<1x2x64xf32, #tpu.memory_space<vmem>>, vector<1x2x64xf32>
      tpu.vector_store %arg9[%c0_42, %c0_43, %c0_44], %79 {strides = array<i32>} : memref<1x2x64xf32, #tpu.memory_space<vmem>>, vector<1x2x64xf32>,
      %cst_45 = arith.constant 0.000000e+00 : f32
      %81 = vector.broadcast %cst_45 : f32 to vector<1x1xf32>
      %c0_46 = arith.constant 0 : index
      %c0_47 = arith.constant 0 : index
      %82 = vector.load %arg10[%c0_46, %c0_47] : memref<1x1xf32, #tpu.memory_space<vmem>>, vector<1x1xf32>
      tpu.vector_store %arg10[%c0_46, %c0_47], %81 {strides = array<i32>} : memref<1x1xf32, #tpu.memory_space<vmem>>, vector<1x1xf32>,
    } else {
    }
    %c0 = arith.constant 0 : index
    %c0_2 = arith.constant 0 : index
    %5 = vector.load %arg2[%c0, %c0_2] : memref<2x32xf32, #tpu.memory_space<vmem>>, vector<2x32xf32>
    %c0_3 = arith.constant 0 : index
    %c0_4 = arith.constant 0 : index
    %c0_5 = arith.constant 0 : index
    %6 = vector.load %arg3[%c0_3, %c0_4, %c0_5] : memref<1x32x64xf32, #tpu.memory_space<vmem>>, vector<1x32x64xf32>
    %7 = vector.shape_cast %6 : vector<1x32x64xf32> to vector<32x64xf32>
    %cst = arith.constant dense<0.000000e+00> : vector<2x64xf32>
    %8 = tpu.matmul %5, %7, %cst {dimension_numbers = #tpu.dot_dimension_numbers<[1], [0], [0], [1], [0, 0, 1, 1], [], []>} : vector<2x32xf32>, vector<32x64xf32>, vector<2x64xf32> -> vector<2x64xf32>
    %cst_6 = arith.constant 0.0176776703 : f32
    %9 = vector.broadcast %cst_6 : f32 to vector<2x64xf32>
    %10 = arith.mulf %8, %9 : vector<2x64xf32>
    %c0_7 = arith.constant 0 : index
    %c0_8 = arith.constant 0 : index
    %11 = vector.load %arg10[%c0_7, %c0_8] : memref<1x1xf32, #tpu.memory_space<vmem>>, vector<1x1xf32>
    %12 = arith.mulf %10, %10 : vector<2x64xf32>
    %13 = vector.shape_cast %12 : vector<2x64xf32> to vector<1x2x64xf32>
    %cst_9 = arith.constant dense<0.000000e+00> : vector<1xf32>
    %14 = vector.multi_reduction <add>, %13, %cst_9 [1, 2] : vector<1x2x64xf32> to vector<1xf32>
    %15 = vector.shape_cast %14 : vector<1xf32> to vector<1x1x1xf32>
    %16 = vector.extract %15[0, 0, 0] : f32 from vector<1x1x1xf32>
    %17 = vector.broadcast %16 : f32 to vector<1x1xf32>
    %18 = arith.addf %11, %17 : vector<1x1xf32>
    %c0_10 = arith.constant 0 : index
    %c0_11 = arith.constant 0 : index
    %19 = vector.load %arg10[%c0_10, %c0_11] : memref<1x1xf32, #tpu.memory_space<vmem>>, vector<1x1xf32>
    tpu.vector_store %arg10[%c0_10, %c0_11], %18 {strides = array<i32>} : memref<1x1xf32, #tpu.memory_space<vmem>>, vector<1x1xf32>,
    %20 = math.tanh %10 : vector<2x64xf32>
    %cst_12 = arith.constant 1.000000e+01 : f32
    %21 = vector.broadcast %cst_12 : f32 to vector<2x64xf32>
    %22 = arith.mulf %21, %20 : vector<2x64xf32>
    %c0_13 = arith.constant 0 : index
    %c0_14 = arith.constant 0 : index
    %23 = vector.load %arg4[%c0_13, %c0_14] : memref<2x2xf32, #tpu.memory_space<vmem>>, vector<2x2xf32>
    %24 = tpu.iota {dimensions = array<i32: 1>} : vector<2x2xi32>
    %25 = vector.broadcast %arg0 : i32 to vector<2x2xi32>
    %26 = arith.cmpi eq, %24, %25 : vector<2x2xi32>
    %27 = arith.extui %26 : vector<2x2xi1> to vector<2x2xi32>
    %28 = arith.sitofp %27 : vector<2x2xi32> to vector<2x2xf32>
    %29 = arith.mulf %23, %28 : vector<2x2xf32>
    %cst_15 = arith.constant dense<0.000000e+00> : vector<2xf32>
    %30 = vector.multi_reduction <add>, %29, %cst_15 [1] : vector<2x2xf32> to vector<2xf32>
    %31 = vector.shape_cast %30 : vector<2xf32> to vector<2x1xf32>
    %32 = arith.index_cast %arg1 : i32 to index
    %c0_16 = arith.constant 0 : index
    %c0_17 = arith.constant 0 : index
    %33 = vector.load %arg9[%32, %c0_16, %c0_17] : memref<1x2x64xf32, #tpu.memory_space<vmem>>, vector<1x2x64xf32>
    %34 = vector.shape_cast %33 : vector<1x2x64xf32> to vector<2x64xf32>
    %35 = vector.broadcast %31 : vector<2x1xf32> to vector<2x64xf32>
    %36 = arith.mulf %35, %22 : vector<2x64xf32>
    %37 = arith.addf %34, %36 : vector<2x64xf32>
    %38 = arith.index_cast %arg1 : i32 to index
    %c0_18 = arith.constant 0 : index
    %c0_19 = arith.constant 0 : index
    %39 = vector.load %arg9[%38, %c0_18, %c0_19] : memref<1x2x64xf32, #tpu.memory_space<vmem>>, vector<1x2x64xf32>
    %40 = vector.shape_cast %39 : vector<1x2x64xf32> to vector<2x64xf32>
    %41 = vector.shape_cast %37 : vector<2x64xf32> to vector<1x2x64xf32>
    tpu.vector_store %arg9[%38, %c0_18, %c0_19], %41 {strides = array<i32>} : memref<1x2x64xf32, #tpu.memory_space<vmem>>, vector<1x2x64xf32>,
    %cst_20 = arith.constant 1.000000e+00 : f32
    %42 = vector.broadcast %cst_20 : f32 to vector<2x1xf32>
    %43 = arith.subf %42, %31 : vector<2x1xf32>
    %44 = vector.broadcast %43 : vector<2x1xf32> to vector<2x64xf32>
    %45 = arith.mulf %44, %22 : vector<2x64xf32>
    %cst_21 = arith.constant 1.000000e+01 : f32
    %46 = vector.broadcast %cst_21 : f32 to vector<2x1xf32>
    %47 = arith.mulf %46, %31 : vector<2x1xf32>
    %48 = vector.broadcast %47 : vector<2x1xf32> to vector<2x64xf32>
    %49 = arith.subf %45, %48 : vector<2x64xf32>
    %cst_22 = arith.constant dense<0xFF800000> : vector<2xf32>
    %50 = vector.multi_reduction <maximumf>, %49, %cst_22 [1] : vector<2x64xf32> to vector<2xf32>
    %51 = vector.shape_cast %50 : vector<2xf32> to vector<2x1xf32>
    %c0_23 = arith.constant 0 : index
    %c0_24 = arith.constant 0 : index
    %52 = vector.load %arg7[%c0_23, %c0_24] : memref<2x1xf32, #tpu.memory_space<vmem>>, vector<2x1xf32>
    %53 = arith.maximumf %52, %51 : vector<2x1xf32>
    %54 = arith.subf %52, %53 : vector<2x1xf32>
    %55 = math.exp %54 : vector<2x1xf32>
    %c0_25 = arith.constant 0 : index
    %c0_26 = arith.constant 0 : index
    %56 = vector.load %arg8[%c0_25, %c0_26] : memref<2x1xf32, #tpu.memory_space<vmem>>, vector<2x1xf32>
    %57 = arith.mulf %56, %55 : vector<2x1xf32>
    %cst_27 = arith.constant 1.000000e+00 : f32
    %58 = vector.broadcast %cst_27 : f32 to vector<2x1xf32>
    %59 = arith.subf %58, %31 : vector<2x1xf32>
    %60 = vector.broadcast %53 : vector<2x1xf32> to vector<2x64xf32>
    %61 = arith.subf %49, %60 : vector<2x64xf32>
    %62 = math.exp %61 : vector<2x64xf32>
    %63 = vector.broadcast %59 : vector<2x1xf32> to vector<2x64xf32>
    %64 = arith.mulf %63, %62 : vector<2x64xf32>
    %cst_28 = arith.constant dense<0.000000e+00> : vector<2xf32>
    %65 = vector.multi_reduction <add>, %64, %cst_28 [1] : vector<2x64xf32> to vector<2xf32>
    %66 = vector.shape_cast %65 : vector<2xf32> to vector<2x1xf32>
    %67 = arith.addf %57, %66 : vector<2x1xf32>
    %c0_29 = arith.constant 0 : index
    %c0_30 = arith.constant 0 : index
    %68 = vector.load %arg8[%c0_29, %c0_30] : memref<2x1xf32, #tpu.memory_space<vmem>>, vector<2x1xf32>
    tpu.vector_store %arg8[%c0_29, %c0_30], %67 {strides = array<i32>} : memref<2x1xf32, #tpu.memory_space<vmem>>, vector<2x1xf32>,
    %c0_31 = arith.constant 0 : index
    %c0_32 = arith.constant 0 : index
    %69 = vector.load %arg7[%c0_31, %c0_32] : memref<2x1xf32, #tpu.memory_space<vmem>>, vector<2x1xf32>
    tpu.vector_store %arg7[%c0_31, %c0_32], %53 {strides = array<i32>} : memref<2x1xf32, #tpu.memory_space<vmem>>, vector<2x1xf32>,
    %c1_i32 = arith.constant 1 : i32
    %70 = arith.cmpi eq, %arg0, %c1_i32 : i32
    %c0_i32_33 = arith.constant 0 : i32
    %71 = arith.cmpi eq, %arg1, %c0_i32_33 : i32
    %72 = arith.andi %70, %71 : i1
    %73 = arith.extui %72 : i1 to i32
    %c0_i32_34 = arith.constant 0 : i32
    %74 = arith.cmpi ne, %73, %c0_i32_34 : i32
    scf.if %74 {
      %c0_35 = arith.constant 0 : index
      %c0_36 = arith.constant 0 : index
      %75 = vector.load %arg7[%c0_35, %c0_36] : memref<2x1xf32, #tpu.memory_space<vmem>>, vector<2x1xf32>
      %c0_37 = arith.constant 0 : index
      %c0_38 = arith.constant 0 : index
      %76 = vector.load %arg8[%c0_37, %c0_38] : memref<2x1xf32, #tpu.memory_space<vmem>>, vector<2x1xf32>
      %c0_39 = arith.constant 0 : index
      %c0_40 = arith.constant 0 : index
      %c0_41 = arith.constant 0 : index
      %77 = vector.load %arg9[%c0_39, %c0_40, %c0_41] : memref<1x2x64xf32, #tpu.memory_space<vmem>>, vector<1x2x64xf32>
      %78 = vector.shape_cast %75 : vector<2x1xf32> to vector<1x2x1xf32>
      %79 = vector.broadcast %78 : vector<1x2x1xf32> to vector<1x2x64xf32>
      %80 = arith.subf %77, %79 : vector<1x2x64xf32>
      %81 = math.exp %80 : vector<1x2x64xf32>
      %82 = vector.shape_cast %76 : vector<2x1xf32> to vector<1x2x1xf32>
      %83 = vector.broadcast %82 : vector<1x2x1xf32> to vector<1x2x64xf32>
      %84 = arith.addf %81, %83 : vector<1x2x64xf32>
      %85 = math.log %84 : vector<1x2x64xf32>
      %86 = arith.subf %80, %85 : vector<1x2x64xf32>
      %cst_42 = arith.constant dense<0.000000e+00> : vector<2x64xf32>
      %87 = vector.multi_reduction <add>, %86, %cst_42 [0] : vector<1x2x64xf32> to vector<2x64xf32>
      %88 = vector.shape_cast %87 : vector<2x64xf32> to vector<1x2x64xf32>
      %cst_43 = arith.constant dense<0.000000e+00> : vector<1xf32>
      %89 = vector.multi_reduction <add>, %88, %cst_43 [1, 2] : vector<1x2x64xf32> to vector<1xf32>
      %90 = vector.shape_cast %89 : vector<1xf32> to vector<1x1x1xf32>
      %91 = vector.extract %90[0, 0, 0] : f32 from vector<1x1x1xf32>
      %92 = vector.broadcast %91 : f32 to vector<1x1xf32>
      %cst_44 = arith.constant 0.000000e+00 : f32
      %93 = vector.broadcast %cst_44 : f32 to vector<1x1xf32>
      %94 = arith.subf %93, %92 : vector<1x1xf32>
      %cst_45 = arith.constant 7.812500e-03 : f32
      %95 = vector.broadcast %cst_45 : f32 to vector<1x1xf32>
      %96 = arith.mulf %94, %95 : vector<1x1xf32>
      %c0_46 = arith.constant 0 : index
      %c0_47 = arith.constant 0 : index
      %97 = vector.load %arg5[%c0_46, %c0_47] : memref<1x1xf32, #tpu.memory_space<vmem>>, vector<1x1xf32>
      tpu.vector_store %arg5[%c0_46, %c0_47], %96 {strides = array<i32>} : memref<1x1xf32, #tpu.memory_space<vmem>>, vector<1x1xf32>,
      %c0_48 = arith.constant 0 : index
      %c0_49 = arith.constant 0 : index
      %98 = vector.load %arg10[%c0_48, %c0_49] : memref<1x1xf32, #tpu.memory_space<vmem>>, vector<1x1xf32>
      %cst_50 = arith.constant 0.01953125 : f32
      %99 = vector.broadcast %cst_50 : f32 to vector<1x1xf32>
      %100 = arith.mulf %98, %99 : vector<1x1xf32>
      %c0_51 = arith.constant 0 : index
      %c0_52 = arith.constant 0 : index
      %101 = vector.load %arg6[%c0_51, %c0_52] : memref<1x1xf32, #tpu.memory_space<vmem>>, vector<1x1xf32>
      tpu.vector_store %arg6[%c0_51, %c0_52], %100 {strides = array<i32>} : memref<1x1xf32, #tpu.memory_space<vmem>>, vector<1x1xf32>,
    } else {
    }
    return
  }
  func.func @transform_0(%arg0: i32, %arg1: i32) -> (i32, i32) {
    %c0_i32 = arith.constant 0 : i32
    %c0_i32_0 = arith.constant 0 : i32
    %c0_i32_1 = arith.constant 0 : i32
    return %c0_i32, %c0_i32_0 : i32, i32
  }
  func.func @transform_1(%arg0: i32, %arg1: i32) -> (i32, i32, i32) {
    %c0_i32 = arith.constant 0 : i32
    %c0_i32_0 = arith.constant 0 : i32
    return %arg0, %c0_i32, %arg1 : i32, i32, i32
  }
  func.func @transform_2(%arg0: i32, %arg1: i32) -> (i32, i32) {
    %c0_i32 = arith.constant 0 : i32
    %c0_i32_0 = arith.constant 0 : i32
    %c0_i32_1 = arith.constant 0 : i32
    return %c0_i32, %c0_i32_0 : i32, i32
  }
  func.func @transform_3(%arg0: i32, %arg1: i32) -> (i32, i32) {
    %c0_i32 = arith.constant 0 : i32
    %c0_i32_0 = arith.constant 0 : i32
    %c0_i32_1 = arith.constant 0 : i32
    return %c0_i32, %c0_i32_0 : i32, i32
  }
  func.func @transform_4(%arg0: i32, %arg1: i32) -> (i32, i32) {
    %c0_i32 = arith.constant 0 : i32
    %c0_i32_0 = arith.constant 0 : i32
    %c0_i32_1 = arith.constant 0 : i32
    return %c0_i32, %c0_i32_0 : i32, i32
  }
}

</mosaic_0001>

<bundles_post_ra>
// kernel: amdim_nce_loss.1
= control target key start
LH: loop header
LB: loop body
LE: loop exit
PB: predicated region body
PF: predicated region fallthrough
CT: control target
= control target key end

     0   :  { %10 = vsyncpa [#allocation7], 0  ;;  %s1062_s0 = inlined_call_operand.hbm [shape: f32[2,32], index: 0, kind: input, shape index: {}]   ;;  %s1063_s1 = inlined_call_operand.hbm [shape: f32[2,32,64], index: 1, kind: input, shape index: {}]   ;;  %s1064_s2 = inlined_call_operand.hbm [shape: f32[2,2], index: 2, kind: input, shape index: {}]   ;;  %s1065_s3 = inlined_call_operand.hbm [shape: f32[1,1], index: 3, kind: output, shape index: {0}]   ;;  %s1066_s4 = inlined_call_operand.hbm [shape: f32[1,1], index: 4, kind: output, shape index: {1}]  }
   0x1   :  { %11 = vsyncpa [#allocation10], 0 }
   0x2   :  { %13 = vsyncpa [#allocation10 + $0x1], 0 }
   0x3   :  { %14 = vsyncpa [#allocation8], 0 }
   0x4   :  { %15 = vsyncpa [#allocation14], 0  ;;  %s908_s15 = smov 0   ;;  %s910_s16 = smov 0  }
   0x5   :  { %s912_s17 = smov 0   ;;  %s914_s18 = smov 0  }
   0x6   :  { %s916_s19 = smov 0   ;;  %s918_s20 = smov 0  }
   0x7 LB: > { %s937_s21 = sadd.s32 4294967295, %s870_s20   ;;  %s63_s22 = sadd.s32 1, %s858_s17  ;;  %s870_s20 = sphi %s918_s20, %s21_s20   ;;  %s866_s19 = sphi %s916_s19, %s1075_s19   ;;  %s862_s18 = sphi %s914_s18, %s1074_s18   ;;  %s858_s17 = sphi %s912_s17, %s1073_s17   ;;  %s854_s16 = sphi %s910_s16, %s1072_s16   ;;  %s850_s15 = sphi %s908_s15, %s1071_s15  }
   0x8   : > { %p70_p0 = scmp.ne.s32.totalorder %s858_s17, %s854_s16  ;;  %p71_p1 = scmp.eq.s32.totalorder %s870_s20, 0 }
   0x9   : > { %p76_p2 = scmp.ne.s32.totalorder %s854_s16, %s850_s15  ;;  %p77_p3 = scmp.eq.s32.totalorder %s937_s21, 0 }
   0xa   : > { %p945_p4 = por %p71_p1, %p70_p0  ;;  %p520_p5 = scmp.ge.s32.totalorder %s870_s20, 1 }
   0xb   : > { %p952_p6 = por %p77_p3, %p76_p2  ;;  %p150_p7 = scmp.lt.s32.totalorder %s870_s20, 3 }
   0xc   : > { %s174_s27 = sshll.u32 %s1064_s2, 4  ;;  %s872_s29 = smov [#allocation11]   ;;  %s175_s27 = int_to_ptr.hbm [resolvable:$true] %s174_s27 }
   0xd   : > { %p960_p8 = pnand %p520_p5, %p150_p7  ;;  %s176_s30 = sshll.u32 %s872_s29, 4  ;;  %s177_s30 = int_to_ptr.vmem [resolvable:$true] %s176_s30 }
   0xe   : > { %p579_p10 = scmp.lt.s32.totalorder %s870_s20, 2  ;;  %s162_s8 = sshll.u32 %s1062_s0, 4  ;;  %s163_s8 = int_to_ptr.hbm [resolvable:$true] %s162_s8 }
   0xf   : > { %p566_p9 = pneg %p960_p8  ;;  %s873_s9 = smov [#allocation6]  }
  0x10   : > { %p971_p12 = pnand %p579_p10, %p945_p4  ;;  %s164_s10 = sshll.u32 %s873_s9, 4  ;;  %s165_s10 = int_to_ptr.vmem [resolvable:$true] %s164_s10 }
  0x11   : > { %p567_p11 = pnand %p566_p9, %p77_p3  ;;  %s33_s11 = sadd.s32 1, %s866_s19 }
  0x12   : > { %p35_p13 = scmp.ge.s32.totalorder %s33_s11, 2  ;;  %s187_s12 = sand.u32 1, %s870_s20  }
  0x13   : > { %572 = dma.hbm_to_vmem [thread:$0]  (!%p567_p11), %s175_s27, 32, %s177_s30, [#allocation10]  }
  0x14   : > { %569 = dma.hbm_to_vmem [thread:$0]  (!%p567_p11), %s163_s8, 32, %s165_s10, [#allocation7]  }
  0x15   : > { %s189_s13 = sand.u32 1, %s858_s17   ;;  %s1077_s11 = smov (%p35_p13, %s33_s11), 0 }
  0x16   : > { %s524_s14 = sshll.u32 %s189_s13, 5  ;;  %s541_s15 = sshll.u32 %s866_s19, 5 }
  0x17   : > { %s58_s23 = ssub.s32 %s866_s19, %s1077_s11  ;;  %s197_s27 = scalar_lea.hbm %s1063_s1, %s541_s15 }
  0x18   : > { %p61_p0 = scmp.eq.s32.totalorder %s58_s23, 0  ;;  %s198_s29 = sshll.u32 %s197_s27, 4  ;;  %s199_s29 = int_to_ptr.hbm [resolvable:$true] %s198_s29 }
  0x19   : > { %s191_s30 = scalar_lea.vmem [#allocation9], %s524_s14  ;;  %s188_s8 = scalar_lea.sflag [#allocation10], %s187_s12 }
  0x1a   : > { %s200_s6 = sshll.u32 %s191_s30, 4  ;;  %s874_s9 = smov 128   ;;  %s201_s6 = int_to_ptr.vmem [resolvable:$true] %s200_s6 }
  0x1b   : > { %s992_s7 = scalar_select %p61_p0, %s858_s17, %s63_s22  }
  0x1c   : > { %s875_s10 = smov 8   ;;  %212 = sbr.rel (%p960_p8) target bundleno = 893 (0x37d), region = 32 }
  0x1d   : > { %576 = dma.hbm_to_vmem [thread:$0]  (!%p971_p12), %s199_s29, 512, %s201_s6, %s188_s8, %s874_s9, %s874_s9, %s875_s10  }
  0x21   : > { %829 = dma.done.wait (%p77_p3), [#allocation7], 32  }
  0x22   : > { %831 = vsyncadd (%p77_p3), [#allocation7], 4294967264  ;;  %s219_s22 = sand.u32 1, %s937_s21   ;;  %s221_s13 = sand.u32 1, %s854_s16  }
  0x23   : > { %s529_s14 = sshll.u32 %s221_s13, 5  ;;  %s220_s12 = scalar_lea.sflag [#allocation10], %s219_s22 }
  0x24   : > { %s223_s15 = scalar_lea.vmem [#allocation9], %s529_s14 }
  0x25   : > { %833 = dma.done.wait (%p952_p6), %s220_s12, 512  }
  0x26   : > { %835 = vsyncadd (%p952_p6), %s220_s12, 4294966784 }
  0x27   : > { %837 = dma.done.wait (%p77_p3), [#allocation10], 32  }
  0x28   : > { %839 = vsyncadd (%p77_p3), [#allocation10], 4294967264  ;;  %p249_p1 = scmp.eq.s32.totalorder %s862_s18, 0 }
  0x29   : > { %vm255_vm0 = vcmask (%p249_p1), 1024   ;;  %vm258_vm1 = vcmask (%p249_p1), 517120   ;;  %v876_v0 = vmov (%p249_p1), -inf   ;;  %vm260_vm2 = vcmask (%p249_p1), 0  }
  0x2a   : > { %254 = sbr.rel (!%p249_p1) target bundleno = 47 (0x2f), region = 48  ;;  %256 = vst.msk [vmem:[#allocation2] sm:$0x3] (%p249_p1), %vm255_vm0, %v876_v0  ;;  %v877_v1 = vmov (%p249_p1), 0.0  }
  0x2b   : > { %257 = vst.msk [vmem:[#allocation3] sm:$0x3] (%p249_p1), %vm255_vm0, %v877_v1 }
  0x2c   : > { %259 = vst.msk [vmem:[#allocation4] sm:$0x3] (%p249_p1), %vm258_vm1, %v877_v1 }
  0x2d   : > { %261 = vst.msk [vmem:[#allocation5] sm:$0x1] (%p249_p1), %vm260_vm2, %v877_v1 }
  0x2f PF: > { %v266_v2 = vld [vmem:[%s223_s15 + $0x18] sm:$0xff]  ;;  %v265_v3 = vld [vmem:[%s223_s15 + $0x10] sm:$0xff]  ;;  %v312_v4 = vlaneseq  ;;  %v314_v5 = vstv %s862_s18  ;;  %v264_v6 = vld [vmem:[%s223_s15 + $0x8] sm:$0xff]  ;;  %vm267_vm4 = vcmask 261120   ;;  %v878_v11 = vmov 0.0   ;;  %p359_p2 = scmp.eq.s32.totalorder %s862_s18, 1 }
  0x30   : > { %283 = vmatpush.msra.mxu0 %v266_v2  ;;  %v311_v8 = vld [vmem:[#allocation11] sm:$0x3]  ;;  %v262_v10 = vld [vmem:[#allocation6] sm:$0x3]  ;;  %vm319_vm5 = vcmask 9216   ;;  %vm294_vm6 = vcmask 517120  }
  0x31   : > { %v313_v7 = vand.u32 127, %v312_v4  ;;  %v263_v9 = vld [vmem:[%s223_s15] sm:$0xff]  ;;  %v879_v30 = vmov 0   ;;  %v336_v36 = vld [vmem:[#allocation2] sm:$0x3]  ;;  %vm356_vm7 = vcmask 1024  }
  0x32   : > { %284 = vmatpush.msra.mxu0 %v265_v3  ;;  %645 = vset.pattern.permute.xlu1 %v879_v30  ;;  %vm307_vm8 = vcmask 0   ;;  %v341_v53 = vld [vmem:[#allocation3] sm:$0x3]  ;;  %v880_v58 = vmov (%p359_p2), 0  }
  0x33   : > { %vm315_vm3 = vcmp.eq.s32.totalorder %v313_v7, %v314_v5  ;;  %v325_v23 = vld [vmem:[#allocation4] sm:$0x3]  ;;  %646 = vset.pattern.permute.xlu0 %v879_v30 }
  0x34   : > { %285 = vmatpush.msra.mxu0 %v264_v6  ;;  %v533_v12 = vsel %vm315_vm3, 1.0, %v878_v11  ;;  %v292_v42 = vld [vmem:[#allocation5] sm:$0x1]  ;;  %653 = vset.pattern.permute.xlu0 (%p359_p2), %v880_v58 }
  0x35   : > { %v318_v13 = vmul.f32 %v533_v12, %v311_v8 }
  0x36   : > { %286 = vmatpush.msra.mxu0 %v263_v9 }
  0x37   : > { %532 = vmatmul.msk.f32.vlgmr.msra.gmra.mxu0 %vm267_vm4, %v262_v10  ;;  %v320_v14 = vsel %vm319_vm5, %v318_v13, 0.0 }
  0x38   : > { %321 = vadd.xlane.f32.xlu0 %v320_v14 }
  0xab   : > { %v322_v19 = vpop.xlane.xlu0 %321 }
  0xac   : > { %v329_v20 = vsub.f32 1.0, %v322_v19  ;;  %v331_v25 = vmul.f32 10.0, %v322_v19 }
  0xb4   : > { %v288_v15 = vpop.f32.mrf.mxu0 }
  0xb5   : > { %v291_v16 = vmul.f32 0.01767767, %v288_v15 }
  0xb7   : > { %647 = vtanh.f32 %v291_v16  ;;  %v293_v17 = vmul.f32 %v291_v16, %v291_v16 }
  0xb9   : > { %v295_v18 = vsel %vm294_vm6, %v293_v17, 0.0 }
  0xba   : > { %296 = vadd.xlane.f32.xlu1 %v295_v18 }
  0xbd   : > { %v648_v21 = vpop.eup %647 }
  0xbe   : > { %v310_v22 = vmul.f32 10.0, %v648_v21 }
  0xc0   : > { %v326_v24 = vmul.f32 %v322_v19, %v310_v22  ;;  %v330_v26 = vmul.f32 %v329_v20, %v310_v22 }
  0xc2   : > { %v327_v27 = vadd.f32 %v326_v24, %v325_v23  ;;  %v332_v28 = vsub.f32 %v330_v26, %v331_v25 }
  0xc4   : > { %328 = vst.msk [vmem:[#allocation4] sm:$0x3] %vm294_vm6, %v327_v27  ;;  %v333_v29 = vsel %vm294_vm6, %v332_v28, -inf }
  0xc5   : > { %334 = vmax.xlane.f32.xlu0 %v333_v29 }
  0xcb   : > { %v366_v60 = vld [vmem:[#allocation4] sm:$0x3] (%p359_p2) }
 0x12d   : > { %v297_v31 = vpop.xlane.xlu1 %296 }
 0x12e   : > { %v298_v32 = vrot.slane %v297_v31, 4 }
 0x130   : > { %v299_v33 = vadd.f32 %v298_v32, %v297_v31 }
 0x132   : > { %v300_v34 = vrot.slane %v299_v33, 2 }
 0x134   : > { %v301_v35 = vadd.f32 %v300_v34, %v299_v33 }
 0x136   : > { %v302_v37 = vrot.slane %v301_v35, 1 }
 0x138   : > { %v335_v38 = vpop.xlane.xlu0 %334  ;;  %v303_v39 = vadd.f32 %v302_v37, %v301_v35 }
 0x139   : > { %v337_v40 = vmax.f32 %v336_v36, %v335_v38 }
 0x13a   : > { %544 = vpush %v303_v39 }
 0x13b   : > { %v338_v41 = vsub.f32 %v336_v36, %v337_v40  ;;  %358 = vst.msk [vmem:[#allocation2] sm:$0x3] %vm356_vm7, %v337_v40  ;;  %345 = vperm.xlu1 %645, %v337_v40  }
 0x13d   : > { %v339_v51 = vmul.f32 1.442695, %v338_v41 }
 0x142   : > { %v364_v57 = vld [vmem:[#allocation2] sm:$0x3] (%p359_p2) }
 0x143   : > { %369 = vperm.xlu0 (%p359_p2), %653, %v364_v57  }
 0x16b   : > { %s545_s24 = spop %544 }
 0x16c   : > { %v305_v43 = vstv %s545_s24 }
 0x16d   : > { %v306_v44 = vadd.f32 %v305_v43, %v292_v42 }
 0x16f   : > { %308 = vst.msk [vmem:[#allocation5] sm:$0x1] %vm307_vm8, %v306_v44 }
 0x176   : > { %v399_v14 = vld [vmem:[#allocation5] sm:$0x1] (%p359_p2) }
 0x177   : > { %v400_v15 = vmul.f32 (%p359_p2), 0.01953125, %v399_v14 }
 0x179   : > { %401 = vst.msk [vmem:[#allocation13] sm:$0x1] (%p359_p2), %vm307_vm8, %v400_v15 }
 0x1ad   : > { %v346_v45 = vpop.permute.xlu1 %345 }
 0x1ae   : > { %v348_v46 = vsub.f32 %v332_v28, %v346_v45 }
 0x1b0   : > { %v349_v47 = vmul.f32 1.442695, %v348_v46 }
 0x1b2   : > { %649 = vpow2.f32 %v349_v47 }
 0x1b3   : > { %651 = vpow2.f32 %v339_v51 }
 0x1b5   : > { %v370_v61 = vpop.permute.xlu0 (%p359_p2), %369 }
 0x1b6   : > { %v372_v62 = vsub.f32 (%p359_p2), %v366_v60, %v370_v61 }
 0x1b8   : > { %v650_v48 = vpop.eup %649  ;;  %v373_v63 = vmul.f32 (%p359_p2), 1.442695, %v372_v62 }
 0x1b9   : > { %v351_v49 = vmul.f32 %v650_v48, %v329_v20  ;;  %v652_v52 = vpop.eup %651 }
 0x1ba   : > { %v342_v54 = vmul.f32 %v652_v52, %v341_v53  ;;  %654 = vpow2.f32 (%p359_p2), %v373_v63 }
 0x1bb   : > { %v352_v50 = vsel %vm294_vm6, %v351_v49, 0.0 }
 0x1bc   : > { %353 = vadd.xlane.f32.xlu2 %v352_v50 }
 0x1c0   : > { %v655_v0 = vpop.eup (%p359_p2), %654 }
 0x22e   : > { %363 = sbr.rel (!%p359_p2) target bundleno = 883 (0x373), region = 52 }
 0x22f   : > { %v354_v55 = vpop.xlane.xlu2 %353 }
 0x230   : > { %v355_v56 = vadd.f32 %v354_v55, %v342_v54 }
 0x232   : > { %357 = vst.msk [vmem:[#allocation3] sm:$0x3] %vm356_vm7, %v355_v56 }
 0x239   : > { %v365_v59 = vld [vmem:[#allocation3] sm:$0x3] }
 0x23a   : > { %377 = vperm.xlu0 %653, %v365_v59  }
 0x2ac   : > { %v378_v1 = vpop.permute.xlu0 %377 }
 0x2ad   : > { %v380_v2 = vadd.f32 %v655_v0, %v378_v1 }
 0x2af   : > { %656 = vlog2.f32 %v380_v2 }
 0x2b5   : > { %v657_v3 = vpop.eup %656 }
 0x2b6   : > { %v382_v4 = vmul.f32 0.6931472, %v657_v3 }
 0x2b8   : > { %v383_v5 = vsub.f32 %v372_v62, %v382_v4 }
 0x2ba   : > { %v385_v6 = vsel %vm294_vm6, %v383_v5, 0.0 }
 0x2bb   : > { %386 = vadd.xlane.f32.xlu1 %v385_v6 }
 0x32e   : > { %v387_v7 = vpop.xlane.xlu1 %386 }
 0x32f   : > { %v388_v8 = vrot.slane %v387_v7, 4 }
 0x331   : > { %v389_v9 = vadd.f32 %v388_v8, %v387_v7 }
 0x333   : > { %v390_v10 = vrot.slane %v389_v9, 2 }
 0x335   : > { %v391_v11 = vadd.f32 %v390_v10, %v389_v9 }
 0x337   : > { %v392_v12 = vrot.slane %v391_v11, 1 }
 0x339   : > { %v393_v13 = vadd.f32 %v392_v12, %v391_v11 }
 0x33b   : > { %546 = vpush %v393_v13 }
 0x36c   : > { %s547_s18 = spop %546 }
 0x36d   : > { %v395_v16 = vstv %s547_s18 }
 0x36e   : > { %v396_v17 = vsub.f32 0.0, %v395_v16 }
 0x370   : > { %v397_v18 = vmul.f32 0.0078125, %v396_v17 }
 0x372   : > { %398 = vst.msk [vmem:[#allocation12] sm:$0x1] %vm307_vm8, %v397_v18 }
 0x373 PF: > { %p582_p3 = scmp.eq.s32.totalorder %s937_s21, 1  ;;  %s410_s23 = sshll.u32 %s1065_s3, 4  ;;  %s411_s23 = int_to_ptr.hbm [resolvable:$true] %s410_s23 }
 0x374   : > { %s881_s25 = smov [#allocation12]   ;;  %s882_s27 = smov [#allocation13]  }
 0x375   : > { %s408_s26 = sshll.u32 %s881_s25, 4  ;;  %s420_s29 = sshll.u32 %s882_s27, 4  ;;  %s409_s26 = int_to_ptr.vmem [resolvable:$true] %s408_s26  ;;  %s421_s29 = int_to_ptr.vmem [resolvable:$true] %s420_s29 }
 0x376   : > { %559 = dma.vmem_to_hbm [thread:$0]  (%p582_p3), %s409_s26, 16, %s411_s23, [#allocation8]  }
 0x377   : > { %s422_s8 = sshll.u32 %s1066_s4, 4  ;;  %s423_s8 = int_to_ptr.hbm [resolvable:$true] %s422_s8 }
 0x378   : > { %561 = dma.vmem_to_hbm [thread:$0]  (%p582_p3), %s421_s29, 16, %s423_s8, [#allocation14]  }
 0x379   : > { %841 = dma.done.wait (%p582_p3), [#allocation8], 16  }
 0x37a   : > { %843 = vsyncadd (%p582_p3), [#allocation8], 4294967280 }
 0x37b   : > { %845 = dma.done.wait (%p582_p3), [#allocation14], 16  }
 0x37c   : > { %847 = vsyncadd (%p582_p3), [#allocation14], 4294967280 }
 0x37d PF: > { %s21_s20 = sadd.s32 1, %s870_s20   ;;  %s1071_s15 = smov %s854_s16 }
 0x37e   : > { %p18_p4 = scmp.ge.s32.totalorder %s21_s20, 4   ;;  %s1072_s16 = smov %s858_s17 }
 0x37f   : > { %s1073_s17 = smov %s992_s7  ;;  %s1074_s18 = smov %s866_s19 }
 0x380   : > { %s1075_s19 = smov %s1077_s11  ;;  %20 = sbr.rel (!%p18_p4) target bundleno = 7 (0x7), region = 95 }
 0x385   :  { %441 = vsyncpa [#allocation7], 1 }
 0x386   :  { %443 = vsyncpa [#allocation7 + $0x1], 1 }
 0x387   :  { %444 = vsyncpa [#allocation10], 1 }
 0x388   :  { %446 = vsyncpa [#allocation10 + $0x1], 1 }
 0x389   :  { %447 = vsyncpa [#allocation8], 1 }
 0x38a   :  { %449 = vsyncpa [#allocation8 + $0x1], 1 }
 0x38b   :  { %450 = vsyncpa [#allocation14], 1 }

</bundles_post_ra>
